<compile_context>
chip_gen: v5e
topology: v5e:2x2
jax: 0.10.0
libtpu: 0.0.40
codegen_flags: <defaults>
</compile_context>

<pallas_src>
import jax
import jax.numpy as jnp
import numpy as np
from jax import lax
from jax.experimental import pallas as pl
from jax.experimental.pallas import tpu as pltpu

SEQ_LEN = 9
C_IN = 4
C_CONV = 64
K = 3
IN_FLAT = SEQ_LEN * C_IN       # 36 raw input taps per example
POOLED = SEQ_LEN // 2          # 4 pooled positions
T_USED = 2 * POOLED            # 8 conv positions consumed by the pool
HALF = POOLED * C_CONV         # 256 = width of each even/odd half of the conv output
WIDE = T_USED * C_CONV         # 512 = banded conv output width
FLAT = C_CONV * POOLED         # 256 = flattened fc1 input
HIDDEN = 128
N_OUT = 2
N_OUT_PAD = 8                  # small padded output width (regular, cheap store)


def _round_up(x, m):
    return (x + m - 1) // m * m


def _cdiv(a, b):
    return -(-a // b)


def dna_kernel(x_ref, wb_ref, bc_ref, w1_ref, b1_ref, w2_ref, b2_ref, out_ref):
    # x_ref: (TB, 36) raw flattened input tile; weight refs are full resident blocks.
    # Conv1d folded into one wide MXU matmul: (TB,36)@(36,512) -> all 8 conv positions.
    h = jnp.dot(x_ref[...], wb_ref[...], preferred_element_type=jnp.float32)
    # MaxPool1d(2,2): the two 256-lane halves hold even/odd conv positions in matching
    # 64-lane blocks, so the pool is a plain elementwise max of aligned halves.
    # Bias + ReLU after the max is exact (bias identical per pair; both monotone).
    pooled = jnp.maximum(jnp.maximum(h[:, :HALF], h[:, HALF:]) + bc_ref[...], 0.0)
    # fc1: single (TB,256)@(256,128) matmul (== flattened fc1), + bias + ReLU.
    z1 = jnp.maximum(
        jnp.dot(pooled, w1_ref[...], preferred_element_type=jnp.float32)
        + b1_ref[...], 0.0)
    # fc2 with output columns zero-padded to 8 -> tiny writeback, sliced in wrapper.
    z2 = jnp.dot(z1, w2_ref[...], preferred_element_type=jnp.float32) + b2_ref[...]
    out_ref[...] = z2.astype(out_ref.dtype)


def _banded_conv_weight(wc_t):
    """Conv1d(4->64,k=3,pad=1) weight (Cout,Cin,K) -> banded (36, 512) matrix.

    Column block layout (pool-pair major): blocks 0..3 hold conv positions 0,2,4,6;
    blocks 4..7 hold positions 1,3,5,7. Row index = s*4 + cin over the raw flattened
    input; out-of-range boundary taps are zero rows.
    """
    wk = jnp.transpose(wc_t.astype(jnp.float32), (2, 1, 0))   # (K, Cin, Cout)
    zero = jnp.zeros((C_IN, C_CONV), jnp.float32)
    cols = []
    for t in range(T_USED):
        rows = []
        for s in range(SEQ_LEN):
            k = s - t + 1                                      # input pos s = t + k - 1
            rows.append(wk[k] if 0 <= k < K else zero)
        cols.append(jnp.concatenate(rows, axis=0))             # (36, 64) for position t
    even = [cols[2 * p] for p in range(POOLED)]
    odd = [cols[2 * p + 1] for p in range(POOLED)]
    return jnp.concatenate(even + odd, axis=1)                 # (36, 512)


def dna_forward(x, params, *, tb=None):
    """x: (B, seq_len=9, 4) float32 (same layout the PyTorch forward receives)."""
    wc_t, bc_t, w1_t, b1_t, w2_t, b2_t = params                # PyTorch-layout params
    B = x.shape[0]

    # Batch tile: up to 512 rows; >=2 grid steps when B permits (v7x dual TensorCore).
    if tb is None:
        tb = min(512, _round_up(max(B, 1), 8))
        if B >= 16:
            tb = min(tb, _round_up(_cdiv(B, 2), 8))
    b_pad = _round_up(B, tb)

    # ---- glue: layout prep only (no im2col) ----
    xf = x.reshape(B, IN_FLAT).astype(jnp.float32)             # (B, 36), idx = s*4 + cin
    x_flat = jnp.pad(xf, ((0, b_pad - B), (0, 0)))             # (B_pad, 36)

    wband = _banded_conv_weight(wc_t)                          # (36, 512)
    bc = jnp.tile(bc_t.reshape(1, C_CONV).astype(jnp.float32), (1, POOLED))  # (1, 256)
    # PyTorch flattens (B, 64, 4) channel-major (idx = c*4 + p); kernel uses idx = p*64 + c.
    w1 = jnp.transpose(w1_t.reshape(HIDDEN, C_CONV, POOLED),
                       (2, 1, 0)).reshape(FLAT, HIDDEN).astype(jnp.float32)
    b1 = b1_t.reshape(1, HIDDEN).astype(jnp.float32)
    # fc2 weight/bias zero-padded to 8 output columns.
    w2 = jnp.zeros((HIDDEN, N_OUT_PAD), jnp.float32).at[:, :N_OUT].set(
        jnp.transpose(w2_t, (1, 0)).astype(jnp.float32))
    b2 = jnp.zeros((1, N_OUT_PAD), jnp.float32).at[:, :N_OUT].set(
        b2_t.reshape(1, N_OUT).astype(jnp.float32))

    grid_spec = pltpu.PrefetchScalarGridSpec(
        num_scalar_prefetch=0,
        grid=(b_pad // tb,),
        in_specs=[
            pl.BlockSpec((tb, IN_FLAT), lambda i: (i, 0)),
            pl.BlockSpec((IN_FLAT, WIDE), lambda i: (0, 0)),
            pl.BlockSpec((1, HALF), lambda i: (0, 0)),
            pl.BlockSpec((FLAT, HIDDEN), lambda i: (0, 0)),
            pl.BlockSpec((1, HIDDEN), lambda i: (0, 0)),
            pl.BlockSpec((HIDDEN, N_OUT_PAD), lambda i: (0, 0)),
            pl.BlockSpec((1, N_OUT_PAD), lambda i: (0, 0)),
        ],
        out_specs=pl.BlockSpec((tb, N_OUT_PAD), lambda i: (i, 0)),
    )
    out = pl.pallas_call(
        dna_kernel,
        out_shape=jax.ShapeDtypeStruct((b_pad, N_OUT_PAD), jnp.float32),
        grid_spec=grid_spec,
        compiler_params=pltpu.CompilerParams(dimension_semantics=("parallel",)),
    )(x_flat, wband, bc, w1, b1, w2, b2)
    return out[:B, :N_OUT]


def reference_forward(x, params):
    """Pure-JAX reference matching the PyTorch forward exactly."""
    wc_t, bc_t, w1_t, b1_t, w2_t, b2_t = params
    B = x.shape[0]
    xt = jnp.transpose(x, (0, 2, 1))                                  # (B, 4, 9)  NCW
    conv = lax.conv_general_dilated(xt, wc_t, window_strides=(1,),
                                    padding=((1, 1),),
                                    dimension_numbers=('NCH', 'OIH', 'NCH'))
    conv = jnp.maximum(conv + bc_t[None, :, None], 0.0)               # (B, 64, 9)
    pooled = jnp.max(conv[:, :, :2 * POOLED].reshape(B, C_CONV, POOLED, 2), axis=-1)
    flat = pooled.reshape(B, FLAT)                                    # idx = c*4 + p
    z1 = jnp.maximum(flat @ w1_t.T + b1_t, 0.0)
    return z1 @ w2_t.T + b2_t


if __name__ == "__main__":
    key = jax.random.PRNGKey(0)
    ks = jax.random.split(key, 7)

    # Deterministic synthetic parameters (PyTorch layouts).
    wc_t = jax.random.normal(ks[1], (C_CONV, C_IN, K), jnp.float32) * 0.1
    bc_t = jax.random.normal(ks[2], (C_CONV,), jnp.float32) * 0.1
    w1_t = jax.random.normal(ks[3], (HIDDEN, FLAT), jnp.float32) * 0.05
    b1_t = jax.random.normal(ks[4], (HIDDEN,), jnp.float32) * 0.05
    w2_t = jax.random.normal(ks[5], (N_OUT, HIDDEN), jnp.float32) * 0.05
    b2_t = jax.random.normal(ks[6], (N_OUT,), jnp.float32) * 0.05
    params = (wc_t, bc_t, w1_t, b1_t, w2_t, b2_t)

    # Small-shape run (B=2, as the module's forward implies: (B, 9, 4)).
    B = 2
    x = jax.random.normal(ks[0], (B, SEQ_LEN, C_IN), jnp.float32)
    out = jax.block_until_ready(dna_forward(x, params))
    ref = reference_forward(x, params)
    np.testing.assert_allclose(np.asarray(out), np.asarray(ref), rtol=1e-4, atol=1e-4)

    # Extra check exercising the multi-tile (2-step) batched grid + padding path.
    B2 = 300
    x2 = jax.random.normal(ks[0], (B2, SEQ_LEN, C_IN), jnp.float32)
    out2 = jax.block_until_ready(dna_forward(x2, params))
    ref2 = reference_forward(x2, params)
    np.testing.assert_allclose(np.asarray(out2), np.asarray(ref2), rtol=1e-4, atol=1e-4)

    print("KERNEL_OK")
</pallas_src>

<mosaic_0001>
module attributes {stable_mosaic.version = 11 : i64} {
  func.func @dna_kernel(%arg0: i32, %arg1: memref<8x36xf32, #tpu.memory_space<vmem>>, %arg2: memref<36x512xf32, #tpu.memory_space<vmem>>, %arg3: memref<1x256xf32, #tpu.memory_space<vmem>>, %arg4: memref<256x128xf32, #tpu.memory_space<vmem>>, %arg5: memref<1x128xf32, #tpu.memory_space<vmem>>, %arg6: memref<128x8xf32, #tpu.memory_space<vmem>>, %arg7: memref<1x8xf32, #tpu.memory_space<vmem>>, %arg8: memref<8x8xf32, #tpu.memory_space<vmem>>) attributes {dimension_semantics = [#tpu.dimension_semantics<parallel>], iteration_bounds = array<i64: 1>, scalar_prefetch = 0 : i64, scratch_operands = 0 : i64, tpu.core_type = #tpu.core_type<tc>, window_params = [{transform_indices = @transform_0, window_bounds = array<i64: 8, 36>}, {pipeline_mode = #tpu.pipeline_mode<synchronous>, transform_indices = @transform_1, window_bounds = array<i64: 36, 512>}, {pipeline_mode = #tpu.pipeline_mode<synchronous>, transform_indices = @transform_2, window_bounds = array<i64: 1, 256>}, {pipeline_mode = #tpu.pipeline_mode<synchronous>, transform_indices = @transform_3, window_bounds = array<i64: 256, 128>}, {pipeline_mode = #tpu.pipeline_mode<synchronous>, transform_indices = @transform_4, window_bounds = array<i64: 1, 128>}, {pipeline_mode = #tpu.pipeline_mode<synchronous>, transform_indices = @transform_5, window_bounds = array<i64: 128, 8>}, {pipeline_mode = #tpu.pipeline_mode<synchronous>, transform_indices = @transform_6, window_bounds = array<i64: 1, 8>}, {transform_indices = @transform_7, window_bounds = array<i64: 8, 8>}]} {
    %c0 = arith.constant 0 : index
    %c0_0 = arith.constant 0 : index
    %0 = vector.load %arg1[%c0, %c0_0] : memref<8x36xf32, #tpu.memory_space<vmem>>, vector<8x36xf32>
    %c0_1 = arith.constant 0 : index
    %c0_2 = arith.constant 0 : index
    %1 = vector.load %arg2[%c0_1, %c0_2] : memref<36x512xf32, #tpu.memory_space<vmem>>, vector<36x512xf32>
    %cst = arith.constant dense<0.000000e+00> : vector<8x512xf32>
    %2 = tpu.matmul %0, %1, %cst {dimension_numbers = #tpu.dot_dimension_numbers<[1], [0], [0], [1], [0, 0, 1, 1], [], []>} : vector<8x36xf32>, vector<36x512xf32>, vector<8x512xf32> -> vector<8x512xf32>
    %3 = vector.extract_strided_slice %2 {offsets = [0, 0], sizes = [8, 256], strides = [1, 1]} : vector<8x512xf32> to vector<8x256xf32>
    %4 = vector.extract_strided_slice %2 {offsets = [0, 256], sizes = [8, 256], strides = [1, 1]} : vector<8x512xf32> to vector<8x256xf32>
    %5 = arith.maximumf %3, %4 : vector<8x256xf32>
    %c0_3 = arith.constant 0 : index
    %c0_4 = arith.constant 0 : index
    %6 = vector.load %arg3[%c0_3, %c0_4] : memref<1x256xf32, #tpu.memory_space<vmem>>, vector<1x256xf32>
    %7 = vector.broadcast %6 : vector<1x256xf32> to vector<8x256xf32>
    %8 = arith.addf %5, %7 : vector<8x256xf32>
    %cst_5 = arith.constant 0.000000e+00 : f32
    %9 = vector.broadcast %cst_5 : f32 to vector<8x256xf32>
    %10 = arith.maximumf %8, %9 : vector<8x256xf32>
    %c0_6 = arith.constant 0 : index
    %c0_7 = arith.constant 0 : index
    %11 = vector.load %arg4[%c0_6, %c0_7] : memref<256x128xf32, #tpu.memory_space<vmem>>, vector<256x128xf32>
    %cst_8 = arith.constant dense<0.000000e+00> : vector<8x128xf32>
    %12 = tpu.matmul %10, %11, %cst_8 {dimension_numbers = #tpu.dot_dimension_numbers<[1], [0], [0], [1], [0, 0, 1, 1], [], []>} : vector<8x256xf32>, vector<256x128xf32>, vector<8x128xf32> -> vector<8x128xf32>
    %c0_9 = arith.constant 0 : index
    %c0_10 = arith.constant 0 : index
    %13 = vector.load %arg5[%c0_9, %c0_10] : memref<1x128xf32, #tpu.memory_space<vmem>>, vector<1x128xf32>
    %14 = vector.broadcast %13 : vector<1x128xf32> to vector<8x128xf32>
    %15 = arith.addf %12, %14 : vector<8x128xf32>
    %cst_11 = arith.constant 0.000000e+00 : f32
    %16 = vector.broadcast %cst_11 : f32 to vector<8x128xf32>
    %17 = arith.maximumf %15, %16 : vector<8x128xf32>
    %c0_12 = arith.constant 0 : index
    %c0_13 = arith.constant 0 : index
    %18 = vector.load %arg6[%c0_12, %c0_13] : memref<128x8xf32, #tpu.memory_space<vmem>>, vector<128x8xf32>
    %cst_14 = arith.constant dense<0.000000e+00> : vector<8x8xf32>
    %19 = tpu.matmul %17, %18, %cst_14 {dimension_numbers = #tpu.dot_dimension_numbers<[1], [0], [0], [1], [0, 0, 1, 1], [], []>} : vector<8x128xf32>, vector<128x8xf32>, vector<8x8xf32> -> vector<8x8xf32>
    %c0_15 = arith.constant 0 : index
    %c0_16 = arith.constant 0 : index
    %20 = vector.load %arg7[%c0_15, %c0_16] : memref<1x8xf32, #tpu.memory_space<vmem>>, vector<1x8xf32>
    %21 = vector.broadcast %20 : vector<1x8xf32> to vector<8x8xf32>
    %22 = arith.addf %19, %21 : vector<8x8xf32>
    %c0_17 = arith.constant 0 : index
    %c0_18 = arith.constant 0 : index
    %23 = vector.load %arg8[%c0_17, %c0_18] : memref<8x8xf32, #tpu.memory_space<vmem>>, vector<8x8xf32>
    tpu.vector_store %arg8[%c0_17, %c0_18], %22 {strides = array<i32>} : memref<8x8xf32, #tpu.memory_space<vmem>>, vector<8x8xf32>,
    return
  }
  func.func @transform_0(%arg0: i32) -> (i32, i32) {
    %c0_i32 = arith.constant 0 : i32
    %c0_i32_0 = arith.constant 0 : i32
    return %arg0, %c0_i32 : i32, i32
  }
  func.func @transform_1(%arg0: i32) -> (i32, i32) {
    %c0_i32 = arith.constant 0 : i32
    %c0_i32_0 = arith.constant 0 : i32
    %c0_i32_1 = arith.constant 0 : i32
    return %c0_i32, %c0_i32_0 : i32, i32
  }
  func.func @transform_2(%arg0: i32) -> (i32, i32) {
    %c0_i32 = arith.constant 0 : i32
    %c0_i32_0 = arith.constant 0 : i32
    %c0_i32_1 = arith.constant 0 : i32
    return %c0_i32, %c0_i32_0 : i32, i32
  }
  func.func @transform_3(%arg0: i32) -> (i32, i32) {
    %c0_i32 = arith.constant 0 : i32
    %c0_i32_0 = arith.constant 0 : i32
    %c0_i32_1 = arith.constant 0 : i32
    return %c0_i32, %c0_i32_0 : i32, i32
  }
  func.func @transform_4(%arg0: i32) -> (i32, i32) {
    %c0_i32 = arith.constant 0 : i32
    %c0_i32_0 = arith.constant 0 : i32
    %c0_i32_1 = arith.constant 0 : i32
    return %c0_i32, %c0_i32_0 : i32, i32
  }
  func.func @transform_5(%arg0: i32) -> (i32, i32) {
    %c0_i32 = arith.constant 0 : i32
    %c0_i32_0 = arith.constant 0 : i32
    %c0_i32_1 = arith.constant 0 : i32
    return %c0_i32, %c0_i32_0 : i32, i32
  }
  func.func @transform_6(%arg0: i32) -> (i32, i32) {
    %c0_i32 = arith.constant 0 : i32
    %c0_i32_0 = arith.constant 0 : i32
    %c0_i32_1 = arith.constant 0 : i32
    return %c0_i32, %c0_i32_0 : i32, i32
  }
  func.func @transform_7(%arg0: i32) -> (i32, i32) {
    %c0_i32 = arith.constant 0 : i32
    %c0_i32_0 = arith.constant 0 : i32
    return %arg0, %c0_i32 : i32, i32
  }
}

</mosaic_0001>

<bundles_post_ra>
// kernel: tpu_custom_call.1
= control target key start
LH: loop header
LB: loop body
LE: loop exit
PB: predicated region body
PF: predicated region fallthrough
CT: control target
= control target key end

     0   :  { %12 = vsyncpa [#allocation3], 0  ;;  %s545_s0 = inlined_call_operand.vmem [shape: f32[8,36], index: 0, kind: input, shape index: {}]   ;;  %s546_s1 = inlined_call_operand.hbm [shape: f32[36,512], index: 1, kind: input, shape index: {}]   ;;  %s547_s2 = inlined_call_operand.vmem [shape: f32[1,256], index: 2, kind: input, shape index: {}]   ;;  %s548_s3 = inlined_call_operand.hbm [shape: f32[256,128], index: 3, kind: input, shape index: {}]   ;;  %s549_s4 = inlined_call_operand.vmem [shape: f32[1,128], index: 4, kind: input, shape index: {}]   ;;  %s550_s5 = inlined_call_operand.vmem [shape: f32[128,8], index: 5, kind: input, shape index: {}]   ;;  %s551_s6 = inlined_call_operand.vmem [shape: f32[1,8], index: 6, kind: input, shape index: {}]   ;;  %s552_s7 = inlined_call_operand.hbm [shape: f32[8,8], index: 7, kind: output, shape index: {}]  }
   0x1   :  { %13 = vsyncpa [#allocation6], 0 }
   0x2   :  { %14 = vsyncpa [#allocation4], 0  ;;  %s21_s26 = sshll.u32 %s546_s1, 4  ;;  %s421_s27 = smov [#allocation2]   ;;  %s22_s26 = int_to_ptr.hbm [resolvable:$true] %s21_s26 }
   0x3   :  { %s23_s28 = sshll.u32 %s421_s27, 4  ;;  %s36_s8 = sshll.u32 %s548_s3, 4  ;;  %s24_s28 = int_to_ptr.vmem [resolvable:$true] %s23_s28  ;;  %s37_s8 = int_to_ptr.hbm [resolvable:$true] %s36_s8 }
   0x4   :  { %s422_s9 = smov 512   ;;  %s423_s10 = smov 32  }
   0x5   :  { %29 = dma.hbm_to_vmem [thread:$0]  %s22_s26, 2560, %s24_s28, [#allocation3], %s422_s9, %s422_s9, %s423_s10  }
   0x6   :  { %s424_s11 = smov [#allocation5]   ;;  %s425_s13 = smov 128  }
   0x7   :  { %s38_s12 = sshll.u32 %s424_s11, 4  ;;  %s426_s14 = smov 8   ;;  %s39_s12 = int_to_ptr.vmem [resolvable:$true] %s38_s12 }
   0x8   :  { %44 = dma.hbm_to_vmem [thread:$0]  %s37_s8, 4096, %s39_s12, [#allocation6], %s425_s13, %s425_s13, %s426_s14  }
   0x9   :  { %415 = dma.done.wait [#allocation3], 2560  }
   0xa   :  { %416 = vsyncadd [#allocation3], 4294964736 }
   0xb   :  { %417 = dma.done.wait [#allocation6], 4096  }
   0xc   :  { %418 = vsyncadd [#allocation6], 4294963200  ;;  %vm84_vm0 = vcmask 1043456   ;;  %v76_v0 = vld [vmem:[#allocation2 + $0x80] sm:$0xf]  ;;  %v204_v6 = vld [vmem:[#allocation5 + $0x78] sm:$0xff] }
   0xd   :  { %v72_v1 = vld [vmem:[#allocation2 + $0x60] sm:$0xff]  ;;  %326 = vmatpush.msk.msra.mxu3 %vm84_vm0, %v76_v0  ;;  %v77_v5 = vld [vmem:[#allocation2 + $0x88] sm:$0xf]  ;;  %v203_v7 = vld [vmem:[#allocation5 + $0x70] sm:$0xff]  ;;  %vm80_vm1 = vcmask 293888   ;;  %225 = vmatpush.msra.mxu0 %v204_v6  ;;  %s427_s25 = smov [#allocation7]  }
   0xe   :  { %v68_v2 = vld [vmem:[#allocation2 + $0x40] sm:$0xff]  ;;  %v73_v9 = vld [vmem:[#allocation2 + $0x68] sm:$0xff]  ;;  %v78_v15 = vld [vmem:[#allocation2 + $0x90] sm:$0xf]  ;;  %s313_s26 = sshll.u32 %s427_s25, 4  ;;  %vm306_vm2 = vcmask 64512   ;;  %s314_s26 = int_to_ptr.vmem [resolvable:$true] %s313_s26 }
   0xf   :  { %109 = vmatpush.msra.mxu3 %v72_v1  ;;  %v64_v3 = vld [vmem:[#allocation2 + $0x20] sm:$0xff]  ;;  %v202_v10 = vld [vmem:[#allocation5 + $0x68] sm:$0xff]  ;;  %226 = vmatpush.msra.mxu0 %v203_v7  ;;  %v74_v16 = vld [vmem:[#allocation2 + $0x70] sm:$0xff] }
  0x10   :  { %v60_v4 = vld [vmem:[#allocation2] sm:$0xff]  ;;  %v69_v11 = vld [vmem:[#allocation2 + $0x48] sm:$0xff]  ;;  %v70_v17 = vld [vmem:[#allocation2 + $0x50] sm:$0xff] }
  0x11   :  { %110 = vmatpush.msra.mxu3 %v68_v2  ;;  %v59_v8 = vld [vmem:[%s545_s0] sm:$0xff]  ;;  %227 = vmatpush.msra.mxu0 %v202_v10  ;;  %v65_v13 = vld [vmem:[#allocation2 + $0x28] sm:$0xff]  ;;  %v66_v18 = vld [vmem:[#allocation2 + $0x30] sm:$0xff] }
  0x12   :  { %v201_v12 = vld [vmem:[#allocation5 + $0x60] sm:$0xff]  ;;  %v61_v14 = vld [vmem:[#allocation2 + $0x8] sm:$0xff]  ;;  %v62_v19 = vld [vmem:[#allocation2 + $0x10] sm:$0xff] }
  0x13   :  { %111 = vmatpush.msra.mxu3 %v64_v3  ;;  %228 = vmatpush.msra.mxu0 %v201_v12  ;;  %v79_v20 = vld [vmem:[#allocation2 + $0x98] sm:$0xf]  ;;  %v199_v27 = vld [vmem:[#allocation5 + $0x50] sm:$0xff]  ;;  %v198_v29 = vld [vmem:[#allocation5 + $0x48] sm:$0xff] }
  0x14   :  { %v75_v21 = vld [vmem:[#allocation2 + $0x78] sm:$0xff]  ;;  %v219_v28 = vld [vmem:[#allocation5 + $0xf0] sm:$0xff]  ;;  %v218_v30 = vld [vmem:[#allocation5 + $0xe8] sm:$0xff] }
  0x15   :  { %112 = vmatpush.msra.mxu3 %v60_v4  ;;  %v71_v22 = vld [vmem:[#allocation2 + $0x58] sm:$0xff]  ;;  %v197_v31 = vld [vmem:[#allocation5 + $0x40] sm:$0xff]  ;;  %v195_v35 = vld [vmem:[#allocation5 + $0x30] sm:$0xff] }
  0x16   :  { %327 = vmatmul.msk.f32.vlgmr.msra.gmra.mxu3 %vm80_vm1, %v59_v8  ;;  %v67_v23 = vld [vmem:[#allocation2 + $0x38] sm:$0xff]  ;;  %v217_v32 = vld [vmem:[#allocation5 + $0xe0] sm:$0xff]  ;;  %v215_v36 = vld [vmem:[#allocation5 + $0xd0] sm:$0xff] }
  0x17   :  { %328 = vmatpush.msk.msrb.mxu3 %vm84_vm0, %v77_v5  ;;  %v63_v24 = vld [vmem:[#allocation2 + $0x18] sm:$0xff]  ;;  %v194_v37 = vld [vmem:[#allocation5 + $0x28] sm:$0xff]  ;;  %v193_v39 = vld [vmem:[#allocation5 + $0x20] sm:$0xff] }
  0x18   :  { %v200_v25 = vld [vmem:[#allocation5 + $0x58] sm:$0xff]  ;;  %v214_v38 = vld [vmem:[#allocation5 + $0xc8] sm:$0xff]  ;;  %v213_v40 = vld [vmem:[#allocation5 + $0xc0] sm:$0xff] }
  0x19   :  { %129 = vmatpush.msrb.mxu3 %v73_v9  ;;  %v220_v26 = vld [vmem:[#allocation5 + $0xf8] sm:$0xff]  ;;  %229 = vmatpush.msra.mxu0 %v200_v25  ;;  %v191_v43 = vld [vmem:[#allocation5 + $0x10] sm:$0xff]  ;;  %v190_v45 = vld [vmem:[#allocation5 + $0x8] sm:$0xff] }
  0x1a   :  { %245 = vmatpush.msra.mxu1 %v220_v26  ;;  %v196_v33 = vld [vmem:[#allocation5 + $0x38] sm:$0xff]  ;;  %v211_v44 = vld [vmem:[#allocation5 + $0xb0] sm:$0xff]  ;;  %v210_v46 = vld [vmem:[#allocation5 + $0xa8] sm:$0xff] }
  0x1b   :  { %130 = vmatpush.msrb.mxu3 %v69_v11  ;;  %230 = vmatpush.msra.mxu0 %v199_v27  ;;  %v216_v34 = vld [vmem:[#allocation5 + $0xd8] sm:$0xff]  ;;  %v189_v47 = vld [vmem:[#allocation5] sm:$0xff]  ;;  %v207_v50 = vld [vmem:[#allocation5 + $0x90] sm:$0xff] }
  0x1c   :  { %246 = vmatpush.msra.mxu1 %v219_v28  ;;  %v192_v41 = vld [vmem:[#allocation5 + $0x18] sm:$0xff]  ;;  %v209_v48 = vld [vmem:[#allocation5 + $0xa0] sm:$0xff]  ;;  %v206_v51 = vld [vmem:[#allocation5 + $0x88] sm:$0xff] }
  0x1d   :  { %131 = vmatpush.msrb.mxu3 %v65_v13  ;;  %231 = vmatpush.msra.mxu0 %v198_v29  ;;  %v212_v42 = vld [vmem:[#allocation5 + $0xb8] sm:$0xff]  ;;  %v205_v52 = vld [vmem:[#allocation5 + $0x80] sm:$0xff]  ;;  %v280_v55 = vld [vmem:[%s550_s5 + $0x70] sm:$0xff] }
  0x1e   :  { %247 = vmatpush.msra.mxu1 %v218_v30  ;;  %v208_v49 = vld [vmem:[#allocation5 + $0x98] sm:$0xff]  ;;  %v279_v56 = vld [vmem:[%s550_s5 + $0x68] sm:$0xff]  ;;  %v278_v57 = vld [vmem:[%s550_s5 + $0x60] sm:$0xff] }
  0x1f   :  { %132 = vmatpush.msrb.mxu3 %v61_v14  ;;  %232 = vmatpush.msra.mxu0 %v197_v31  ;;  %v281_v54 = vld [vmem:[%s550_s5 + $0x78] sm:$0xff]  ;;  %v276_v60 = vld [vmem:[%s550_s5 + $0x50] sm:$0xff]  ;;  %v275_v61 = vld [vmem:[%s550_s5 + $0x48] sm:$0xff] }
  0x20   :  { %329 = vmatmul.msk.f32.vlgmr.msrb.gmra.mxu3 %vm80_vm1, %v59_v8  ;;  %248 = vmatpush.msra.mxu1 %v217_v32  ;;  %v277_v58 = vld [vmem:[%s550_s5 + $0x58] sm:$0xff]  ;;  %v179_v62 = vld [vmem:[%s547_s2] sm:$0x3]  ;;  %v272_v11 = vld [vmem:[%s550_s5 + $0x30] sm:$0xff] }
  0x21   :  { %330 = vmatpush.msk.msra.mxu3 %vm84_vm0, %v78_v15  ;;  %233 = vmatpush.msra.mxu0 %v196_v33  ;;  %v274_v63 = vld [vmem:[%s550_s5 + $0x40] sm:$0xff]  ;;  %v181_v0 = vperm.slane %v179_v62, 0  ;;  %v273_v1 = vld [vmem:[%s550_s5 + $0x38] sm:$0xff]  ;;  %v182_v6 = vperm.slane %v179_v62, 1  ;;  %v271_v12 = vld [vmem:[%s550_s5 + $0x28] sm:$0xff] }
  0x22   :  { %249 = vmatpush.msra.mxu1 %v216_v34  ;;  %286 = vmatpush.msra.mxu2 %v281_v54  ;;  %v270_v13 = vld [vmem:[%s550_s5 + $0x20] sm:$0xff]  ;;  %v269_v14 = vld [vmem:[%s550_s5 + $0x18] sm:$0xff]  ;;  %v268_v15 = vld [vmem:[%s550_s5 + $0x10] sm:$0xff] }
  0x23   :  { %149 = vmatpush.msra.mxu3 %v74_v16  ;;  %234 = vmatpush.msra.mxu0 %v195_v35  ;;  %v267_v16 = vld [vmem:[%s550_s5 + $0x8] sm:$0xff] }
  0x24   :  { %250 = vmatpush.msra.mxu1 %v215_v36  ;;  %287 = vmatpush.msra.mxu2 %v280_v55 }
  0x25   :  { %150 = vmatpush.msra.mxu3 %v70_v17  ;;  %235 = vmatpush.msra.mxu0 %v194_v37  ;;  %v266_v17 = vld [vmem:[%s550_s5] sm:$0xff]  ;;  %s315_s5 = sshll.u32 %s552_s7, 4  ;;  %s316_s5 = int_to_ptr.hbm [resolvable:$true] %s315_s5 }
  0x26   :  { %251 = vmatpush.msra.mxu1 %v214_v38  ;;  %288 = vmatpush.msra.mxu2 %v279_v56 }
  0x27   :  { %151 = vmatpush.msra.mxu3 %v66_v18  ;;  %236 = vmatpush.msra.mxu0 %v193_v39  ;;  %v341_v18 = vld [vmem:[%s549_s4] ss:$0 sm:$0xff] }
  0x28   :  { %252 = vmatpush.msra.mxu1 %v213_v40  ;;  %289 = vmatpush.msra.mxu2 %v278_v57 }
  0x29   :  { %152 = vmatpush.msra.mxu3 %v62_v19  ;;  %237 = vmatpush.msra.mxu0 %v192_v41 }
  0x2a   :  { %331 = vmatmul.msk.f32.vlgmr.msra.gmra.mxu3 %vm80_vm1, %v59_v8  ;;  %253 = vmatpush.msra.mxu1 %v212_v42 }
  0x2b   :  { %332 = vmatpush.msk.msrb.mxu3 %vm84_vm0, %v79_v20  ;;  %238 = vmatpush.msra.mxu0 %v191_v43 }
  0x2c   :  { %254 = vmatpush.msra.mxu1 %v211_v44  ;;  %290 = vmatpush.msra.mxu2 %v277_v58 }
  0x2d   :  { %169 = vmatpush.msrb.mxu3 %v75_v21  ;;  %239 = vmatpush.msra.mxu0 %v190_v45 }
  0x2e   :  { %255 = vmatpush.msra.mxu1 %v210_v46  ;;  %291 = vmatpush.msra.mxu2 %v276_v60 }
  0x2f   :  { %170 = vmatpush.msrb.mxu3 %v71_v22  ;;  %240 = vmatpush.msra.mxu0 %v189_v47 }
  0x30   :  { %256 = vmatpush.msra.mxu1 %v209_v48  ;;  %292 = vmatpush.msra.mxu2 %v275_v61 }
  0x31   :  { %171 = vmatpush.msrb.mxu3 %v67_v23 }
  0x32   :  { %257 = vmatpush.msra.mxu1 %v208_v49  ;;  %293 = vmatpush.msra.mxu2 %v274_v63 }
  0x33   :  { %172 = vmatpush.msrb.mxu3 %v63_v24  ;;  %v342_v24 = vld [vmem:[%s551_s6] ss:$0 sm:$0xff] }
  0x34   :  { %333 = vmatmul.msk.f32.vlgmr.msrb.gmra.mxu3 %vm80_vm1, %v59_v8  ;;  %258 = vmatpush.msra.mxu1 %v207_v50 }
  0x35   :  { %294 = vmatpush.msra.mxu2 %v273_v1 }
  0x36   :  { %259 = vmatpush.msra.mxu1 %v206_v51 }
  0x37   :  { %295 = vmatpush.msra.mxu2 %v272_v11 }
  0x38   :  { %260 = vmatpush.msra.mxu1 %v205_v52 }
  0x39   :  { %296 = vmatpush.msra.mxu2 %v271_v12 }
  0x3b   :  { %297 = vmatpush.msra.mxu2 %v270_v13 }
  0x3d   :  { %298 = vmatpush.msra.mxu2 %v269_v14 }
  0x3f   :  { %299 = vmatpush.msra.mxu2 %v268_v15 }
  0x41   :  { %300 = vmatpush.msra.mxu2 %v267_v16 }
  0x43   :  { %301 = vmatpush.msra.mxu2 %v266_v17 }
  0x99   :  { %v114_v53 = vpop.f32.mrf.mxu3 }
  0xa3   :  { %v134_v59 = vpop.f32.mrf.mxu3 }
  0xad   :  { %v154_v2 = vpop.f32.mrf.mxu3 }
  0xae   :  { %v177_v3 = vmax.f32 %v114_v53, %v154_v2 }
  0xb0   :  { %v185_v4 = vadd.f32 %v181_v0, %v177_v3 }
  0xb2   :  { %v187_v5 = vmax.f32 %v185_v4, 0.0 }
  0xb4   :  { %241 = vmatmul.f32.vlgmr.msra.gmra.mxu0 %v187_v5 }
  0xb7   :  { %v174_v7 = vpop.f32.mrf.mxu3 }
  0xb8   :  { %v178_v8 = vmax.f32 %v134_v59, %v174_v7 }
  0xba   :  { %v186_v9 = vadd.f32 %v182_v6, %v178_v8 }
  0xbc   :  { %v188_v10 = vmax.f32 %v186_v9, 0.0 }
  0xbe   :  { %261 = vmatmul.f32.vlgmr.msra.gmra.mxu1 %v188_v10 }
 0x131   :  { %v242_v19 = vpop.f32.mrf.mxu0 }
 0x132   :  { %v243_v20 = vadd.f32 %v341_v18, %v242_v19 }
 0x13b   :  { %v262_v21 = vpop.f32.mrf.mxu1 }
 0x13c   :  { %v263_v22 = vadd.f32 %v262_v21, %v243_v20 }
 0x13e   :  { %v265_v23 = vmax.f32 %v263_v22, 0.0 }
 0x140   :  { %302 = vmatmul.f32.vlgmr.msra.gmra.mxu2 %v265_v23 }
 0x1c3   :  { %v303_v25 = vpop.f32.mrf.mxu2 }
 0x1c4   :  { %v304_v26 = vadd.f32 %v342_v24, %v303_v25 }
 0x1c6   :  { %307 = vst.msk [vmem:[#allocation7] sm:$0xff] %vm306_vm2, %v304_v26 }
 0x1c7   :  { %318 = dma.vmem_to_hbm [thread:$0]  %s314_s26, 128, %s316_s5, [#allocation4]  }
 0x1c8   :  { %419 = dma.done.wait [#allocation4], 128  }
 0x1c9   :  { %420 = vsyncadd [#allocation4], 4294967168 }
 0x1ca   :  { %323 = vsyncpa [#allocation3], 1 }
 0x1cb   :  { %324 = vsyncpa [#allocation6], 1 }
 0x1cc   :  { %325 = vsyncpa [#allocation4], 1 }

</bundles_post_ra>
